<compile_context>
chip_gen: v6e
topology: v6e:2x2x1
jax: 0.10.0
libtpu: 0.0.40
codegen_flags: <defaults>
</compile_context>

<pallas_src>
import functools

import jax
import jax.numpy as jnp
from jax.experimental import pallas as pl
from jax.experimental.pallas import tpu as pltpu

_MIB = 1024 * 1024


def _row_dropout_kernel(x_ref, m_ref, o_ref, *, align_hint):
    """x_ref/o_ref: VMEM (tb, td) tiles; m_ref: VMEM-resident (B_pad, 1) f32 scales."""
    tb = x_ref.shape[0]
    row0 = pl.multiple_of(pl.program_id(0) * tb, align_hint)
    m = m_ref[pl.ds(row0, tb), :]                        # (tb, 1) f32 — no per-step DMA
    o_ref[...] = (x_ref[...] * m).astype(o_ref.dtype)    # broadcast over lanes


def dropout_if_training(x: jax.Array, seed: int, *, p: float = 0.0,
                        training: bool = True, donate_x: bool = False,
                        block_rows: int | None = None) -> jax.Array:
    """Pallas implementation of DropoutIfTraining with an Identity submodule.

    x: (B, D) array. Whole rows are dropped with probability p and survivors
    scaled by 1/(1-p) when training; identity otherwise.
    """
    # TODO(synk): submodule is nn.Identity() in this config; a non-identity
    # submodule should be fused inside this pallas_call before the row-scale
    # multiply rather than run as a separate kernel.
    assert 0.0 <= p <= 1.0

    # Eval mode or p == 0: dropout is the identity — no kernel, no HBM traffic.
    if (not training) or p == 0.0:
        return x
    # p == 1: PyTorch dropout returns zeros (avoid 0 * inf = NaN).
    if p >= 1.0:
        return jnp.zeros_like(x)

    B, D = x.shape
    itemsize = jnp.dtype(x.dtype).itemsize
    # Sub-32-bit dtypes pack along sublanes: 8 rows f32, 16 bf16, 32 int8/fp8.
    row_align = max(8, 32 // itemsize)
    lane_align = 128

    # Generation-aware block cap: v5e/v6e (128 MiB VMEM) -> 16 MiB blocks,
    # v7x (64 MiB per TC) -> 8 MiB blocks.
    try:
        vmem_cap = int(pltpu.get_tpu_info().vmem_capacity_bytes)
    except Exception:  # conservative fallback (v7x per-TC)
        vmem_cap = 64 * _MIB
    block_cap = int(min(16 * _MIB, max(2 * _MIB, vmem_cap // 8)))

    row_bytes = D * itemsize
    if row_align * row_bytes <= block_cap:
        # Full rows fit: tile only the batch axis, keep the block lane-dense.
        td = D
        tb = (block_cap // row_bytes) // row_align * row_align
        tb = int(max(row_align, min(B, tb)))
    else:
        # Very wide D: add a lane-dense D grid axis so the block stays under cap.
        assert D % lane_align == 0, "wide-D tiling requires D % 128 == 0"
        tb = int(min(B, row_align))
        td = (block_cap // (max(tb, 1) * itemsize)) // lane_align * lane_align
        td = int(max(lane_align, min(D, td)))

    if block_rows is not None:
        tb = int(max(row_align, min(B, (block_rows // row_align) * row_align)))
    elif B >= 2 * row_align and tb >= B:
        # Keep >=2 batch blocks so the "parallel" axis feeds both TCs on v7x
        # (and the pipeline has something to overlap on v5e/v6e).
        tb = int(max(row_align, (B // 2) // row_align * row_align))

    grid_b = int(pl.cdiv(B, tb))
    grid_d = int(pl.cdiv(D, td))

    # Per-row keep scale (one Bernoulli per batch row), kept in f32 so the
    # 1/(1-p) rescale is exact; only the product is cast back to x.dtype.
    key = jax.random.PRNGKey(seed)
    keep = jax.random.bernoulli(key, 1.0 - p, (B, 1))
    mask = keep.astype(jnp.float32) * jnp.float32(1.0 / (1.0 - p))
    # Pad the resident mask to grid_b * tb rows so the in-kernel dynamic slice
    # never reads out of bounds when B % tb != 0.  The pad value is irrelevant:
    # Pallas masks the padded output rows on write (fine for this elementwise
    # op — do NOT rely on padded rows if a reduction is ever added here).
    b_pad = int(grid_b * tb)
    if b_pad != B:
        mask = jnp.pad(mask, ((0, b_pad - B), (0, 0)))

    align_hint = row_align if tb % row_align == 0 else 1

    block_bytes = tb * td * itemsize
    vmem_limit = int(min(max(32 * _MIB, 4 * block_bytes + 8 * _MIB),
                         max(32 * _MIB, vmem_cap - 8 * _MIB)))

    cost = pl.CostEstimate(
        flops=B * D,
        transcendentals=0,
        bytes_accessed=2 * B * D * itemsize + b_pad * 4,
    )

    kernel = functools.partial(_row_dropout_kernel, align_hint=align_hint)

    return pl.pallas_call(
        kernel,
        out_shape=jax.ShapeDtypeStruct((B, D), x.dtype),
        grid=(grid_b, grid_d),
        in_specs=[
            # x: streamed lane-dense (tb, td) tiles, auto double-buffered.
            pl.BlockSpec((tb, td), lambda i, j: (i, j)),
            # mask: constant block index -> DMA'd once, stays VMEM-resident.
            pl.BlockSpec((b_pad, 1), lambda i, j: (0, 0)),
        ],
        out_specs=pl.BlockSpec((tb, td), lambda i, j: (i, j)),
        compiler_params=pltpu.CompilerParams(
            dimension_semantics=("parallel", "parallel"),
            vmem_limit_bytes=vmem_limit,
        ),
        cost_estimate=cost,
        # Reuse x's HBM buffer for the output when the caller donates x.
        input_output_aliases=({0: 0} if donate_x else {}),
    )(x, mask)


if __name__ == "__main__":
    root = jax.random.PRNGKey(0)
    p, seed = 0.5, 1234

    # --- Case 1: single-block path (B=8, D=256, f32), training.
    B, D = 8, 256
    x = jax.random.normal(root, (B, D), dtype=jnp.float32)
    out = jax.block_until_ready(dropout_if_training(x, seed, p=p, training=True))
    keep = jax.random.bernoulli(jax.random.PRNGKey(seed), 1.0 - p, (B, 1))
    ref = x * (keep.astype(jnp.float32) / (1.0 - p))
    assert out.shape == x.shape and out.dtype == x.dtype
    assert jnp.allclose(out, ref, atol=1e-6), "row-dropout mismatch vs reference"

    # --- Case 2: multi-step grid, resident-mask dynamic slicing, B % tb != 0.
    B2, D2 = 40, 256
    x2 = jax.random.normal(jax.random.PRNGKey(1), (B2, D2), dtype=jnp.float32)
    out2 = jax.block_until_ready(
        dropout_if_training(x2, seed, p=p, training=True, block_rows=16))
    keep2 = jax.random.bernoulli(jax.random.PRNGKey(seed), 1.0 - p, (B2, 1))
    ref2 = x2 * (keep2.astype(jnp.float32) / (1.0 - p))
    assert jnp.allclose(out2, ref2, atol=1e-6), "multi-block path mismatch"

    # --- Eval mode: identity (short-circuited, no kernel launch).
    out_eval = jax.block_until_ready(dropout_if_training(x, seed, p=p, training=False))
    assert jnp.allclose(out_eval, x), "eval mode must be identity"

    # --- p == 1: all rows dropped (zeros), matching torch F.dropout.
    out_all = jax.block_until_ready(dropout_if_training(x, seed, p=1.0, training=True))
    assert jnp.all(out_all == 0), "p=1 must zero everything"

    print("KERNEL_OK")
</pallas_src>

<mosaic_0001>
module attributes {stable_mosaic.version = 11 : i64} {
  func.func @_row_dropout_kernel(%arg0: i32, %arg1: i32, %arg2: memref<8x256xf32, #tpu.memory_space<vmem>>, %arg3: memref<8x1xf32, #tpu.memory_space<vmem>>, %arg4: memref<8x256xf32, #tpu.memory_space<vmem>>) attributes {dimension_semantics = [#tpu.dimension_semantics<parallel>, #tpu.dimension_semantics<parallel>], iteration_bounds = array<i64: 1, 1>, scalar_prefetch = 0 : i64, scratch_operands = 0 : i64, tpu.core_type = #tpu.core_type<tc>, window_params = [{transform_indices = @transform_0, window_bounds = array<i64: 8, 256>}, {pipeline_mode = #tpu.pipeline_mode<synchronous>, transform_indices = @transform_1, window_bounds = array<i64: 8, 1>}, {transform_indices = @transform_2, window_bounds = array<i64: 8, 256>}]} {
    %c8_i32 = arith.constant 8 : i32
    %0 = arith.muli %arg0, %c8_i32 : i32
    %1 = tpu.assume_multiple %0, 8 : i32
    %2 = arith.index_cast %1 : i32 to index
    %c0 = arith.constant 0 : index
    %3 = vector.load %arg3[%2, %c0] : memref<8x1xf32, #tpu.memory_space<vmem>>, vector<8x1xf32>
    %c0_0 = arith.constant 0 : index
    %c0_1 = arith.constant 0 : index
    %4 = vector.load %arg2[%c0_0, %c0_1] : memref<8x256xf32, #tpu.memory_space<vmem>>, vector<8x256xf32>
    %5 = vector.broadcast %3 : vector<8x1xf32> to vector<8x256xf32>
    %6 = arith.mulf %4, %5 : vector<8x256xf32>
    %c0_2 = arith.constant 0 : index
    %c0_3 = arith.constant 0 : index
    %7 = vector.load %arg4[%c0_2, %c0_3] : memref<8x256xf32, #tpu.memory_space<vmem>>, vector<8x256xf32>
    tpu.vector_store %arg4[%c0_2, %c0_3], %6 {strides = array<i32>} : memref<8x256xf32, #tpu.memory_space<vmem>>, vector<8x256xf32>,
    return
  }
  func.func @transform_0(%arg0: i32, %arg1: i32) -> (i32, i32) {
    %c0_i32 = arith.constant 0 : i32
    return %arg0, %arg1 : i32, i32
  }
  func.func @transform_1(%arg0: i32, %arg1: i32) -> (i32, i32) {
    %c0_i32 = arith.constant 0 : i32
    %c0_i32_0 = arith.constant 0 : i32
    %c0_i32_1 = arith.constant 0 : i32
    return %c0_i32, %c0_i32_0 : i32, i32
  }
  func.func @transform_2(%arg0: i32, %arg1: i32) -> (i32, i32) {
    %c0_i32 = arith.constant 0 : i32
    return %arg0, %arg1 : i32, i32
  }
}

</mosaic_0001>

<bundles_post_ra>
// kernel: tpu_custom_call.1
= control target key start
LH: loop header
LB: loop body
LE: loop exit
PB: predicated region body
PF: predicated region fallthrough
CT: control target
= control target key end

     0   :  { %7 = vsyncpa [#allocation3], 0  ;;  %s128_s0 = inlined_call_operand.hbm [shape: f32[8,256], index: 0, kind: input, shape index: {}]   ;;  %s129_s1 = inlined_call_operand.vmem [shape: f32[8,1], index: 1, kind: input, shape index: {}]   ;;  %s130_s2 = inlined_call_operand.hbm [shape: f32[8,256], index: 2, kind: output, shape index: {}]  }
   0x1   :  { %8 = vsyncpa [#allocation4], 0  ;;  %s101_s9 = smov [#allocation2]  }
   0x2   :  { %s15_s10 = sshll.u32 %s101_s9, 4  ;;  %s16_s10 = int_to_ptr.vmem [resolvable:$true] %s15_s10 }
   0x3   :  { %s65_s11 = scalar_lea.vmem %s16_s10, 256  ;;  %p70_p1 = scmp.lt.s32.totalorder %s16_s10, %s16_s10 }
   0x4   :  { %p66_p0 = scmp.ne.s32.totalorder %s16_s10, %s65_s11  ;;  %p71_p2 = scmp.lt.s32.totalorder %s65_s11, %s65_s11 }
   0x6   :  { %p72_p3 = por %p71_p2, %p70_p1 }
   0x8   :  { %p73_p4 = pnand %p72_p3, %p66_p0 }
   0xa   :  { %76 = shalt.err (!%p73_p4)
}
   0xb   :  { %18 = dma.hbm_to_vmem [thread:$0]  %s128_s0, 256, %s16_s10, [#allocation3]  }
   0xc   :  { %97 = dma.done.wait [#allocation3], 256  }
   0xd   :  { %98 = vsyncadd [#allocation3], 4294967040  ;;  %v102_v0 = vmov 0   ;;  %v26_v1 = vld [vmem:[%s129_s1] sm:$0xff]  ;;  %v28_v3 = vld [vmem:[#allocation2 + $0x8] sm:$0xff]  ;;  %s103_s16 = smov [#allocation5]  }
   0xe   :  { %56 = vset.pattern.permute.xlu0 %v102_v0  ;;  %v27_v2 = vld [vmem:[#allocation2] sm:$0xff]  ;;  %s44_s17 = sshll.u32 %s103_s16, 4  ;;  %s45_s17 = int_to_ptr.vmem [resolvable:$true] %s44_s17 }
   0xf   :  { %31 = vperm.xlu0 %56, %v26_v1   ;;  %s77_s0 = scalar_lea.vmem %s45_s17, 256  ;;  %p82_p6 = scmp.lt.s32.totalorder %s45_s17, %s45_s17 }
  0x10   :  { %p78_p5 = scmp.ne.s32.totalorder %s45_s17, %s77_s0  ;;  %p83_p7 = scmp.lt.s32.totalorder %s77_s0, %s77_s0 }
  0x12   :  { %p84_p8 = por %p83_p7, %p82_p6 }
  0x14   :  { %p85_p9 = pnand %p84_p8, %p78_p5 }
  0x8a   :  { %v32_v4 = vpop.permute.xlu0 %31 }
  0x8b   :  { %v34_v5 = vmul.f32 %v32_v4, %v27_v2  ;;  %v35_v6 = vmul.f32 %v32_v4, %v28_v3 }
  0x8d   :  { %36 = vst [vmem:[#allocation5] sm:$0xff] %v34_v5  ;;  %37 = vst [vmem:[#allocation5 + $0x8] sm:$0xff] %v35_v6 }
  0x8e   :  { %88 = shalt.err (!%p85_p9)
}
  0x8f   :  { %47 = dma.vmem_to_hbm [thread:$0]  %s45_s17, 256, %s130_s2, [#allocation4]  }
  0x90   :  { %99 = dma.done.wait [#allocation4], 256  }
  0x91   :  { %100 = vsyncadd [#allocation4], 4294967040 }
  0x92   :  { %51 = vsyncpa [#allocation3], 1 }
  0x93   :  { %52 = vsyncpa [#allocation4], 1 }

</bundles_post_ra>
